<compile_context>
chip_gen: v7x
topology: tpu7x:2x2x1
jax: 0.10.0
libtpu: 0.0.40
codegen_flags: <defaults>
</compile_context>

<pallas_src>
import functools
import math

import jax
import jax.numpy as jnp
from jax.experimental import pallas as pl
from jax.experimental.pallas import tpu as pltpu


def _round_up(a: int, b: int) -> int:
    return (a + b - 1) // b * b


def _gelu(h, approximate: bool):
    if approximate:
        # tanh-approx GELU: matches torch.nn.GELU(approximate='tanh'); tanh runs on
        # the otherwise-idle EUP slot.
        return jax.nn.gelu(h, approximate=True)
    # Exact erf GELU (torch.nn.GELU() default).
    return 0.5 * h * (1.0 + jax.lax.erf(h * (1.0 / math.sqrt(2.0))))


def mlp_resident_kernel(x_ref, w1_ref, b1_ref, w2_ref, b2_ref, o_ref, *, approx_gelu):
    """Weights-resident path: one grid axis over M row tiles.

    x_ref  : (tm, D)   input dtype (cast to compute dtype in-kernel)
    w1_ref : (D, F)    compute dtype (bf16), constant index map -> fetched once
    b1_ref : (1, F)    f32
    w2_ref : (F, D)    compute dtype, constant index map -> fetched once
    b2_ref : (1, D)    f32
    o_ref  : (tm, D)   output dtype
    """
    x = x_ref[...].astype(w1_ref.dtype)
    h = jnp.dot(x, w1_ref[...], preferred_element_type=jnp.float32) + b1_ref[...]
    h = _gelu(h, approx_gelu)                      # dropout_1: identity (eval mode)
    out = jnp.dot(h.astype(w2_ref.dtype), w2_ref[...],
                  preferred_element_type=jnp.float32) + b2_ref[...]
    o_ref[...] = out.astype(o_ref.dtype)           # dropout_2: identity (eval mode)


def mlp_streaming_kernel(x_ref, w1_ref, b1_ref, w2_ref, b2_ref, o_ref, acc_ref,
                         *, approx_gelu):
    """F-streaming path: grid = (M tiles, F tiles), resident f32 accumulator.

    x_ref  : (tm, D)   input dtype
    w1_ref : (D, tf)   compute dtype
    b1_ref : (1, tf)   f32
    w2_ref : (tf, D)   compute dtype
    b2_ref : (1, D)    f32
    o_ref  : (tm, D)   output dtype (written on the last F step)
    acc_ref: (tm, D)   f32 scratch accumulator, resident across the F axis
    """
    f = pl.program_id(1)

    @pl.when(f == 0)
    def _():
        # Fold the final bias add into the accumulator init.
        acc_ref[...] = jnp.broadcast_to(b2_ref[...], acc_ref.shape)

    x = x_ref[...].astype(w1_ref.dtype)
    h = jnp.dot(x, w1_ref[...], preferred_element_type=jnp.float32) + b1_ref[...]
    h = _gelu(h, approx_gelu)                      # dropout_1: identity (eval mode)
    acc_ref[...] += jnp.dot(h.astype(w2_ref.dtype), w2_ref[...],
                            preferred_element_type=jnp.float32)

    @pl.when(f == pl.num_programs(1) - 1)
    def _():
        o_ref[...] = acc_ref[...].astype(o_ref.dtype)   # dropout_2: identity


@functools.partial(
    jax.jit,
    static_argnames=("tm", "tf", "compute_dtype", "approx_gelu", "residency"))
def mlp_forward(x, w1, b1, w2, b2, *, tm=512, tf=1024,
                compute_dtype=jnp.bfloat16, approx_gelu=False, residency="auto"):
    """Eval-mode ViT MLP: x [B, S, D] -> [B, S, D]."""
    B, S, D = x.shape
    F = w1.shape[1]
    M = B * S

    x_itemsize = jnp.dtype(x.dtype).itemsize
    out_dtype = x.dtype
    out_itemsize = jnp.dtype(out_dtype).itemsize
    c_itemsize = jnp.dtype(compute_dtype).itemsize

    # Row tile: multiple of 128 for real shapes (MXU M granularity), multiple of 16
    # for toy shapes (bf16 sublane packing).  No wrapper-side padding of x: the grid
    # uses cdiv and Pallas masks the partial edge block on writeback.
    if M >= 128:
        tm_eff = min(tm, _round_up(M, 128))
    else:
        tm_eff = _round_up(M, 16)
    m_steps = pl.cdiv(M, tm_eff)

    # VMEM budget from the actual part (v5e/v6e: 128 MiB, v7x: 64 MiB per TC).
    try:
        vmem_cap = int(pltpu.get_tpu_info().vmem_capacity_bytes)
    except Exception:  # pragma: no cover - conservative fallback
        vmem_cap = 64 * 1024 * 1024
    vmem_limit = max(32 * 1024 * 1024,
                     min(vmem_cap - 16 * 1024 * 1024, 112 * 1024 * 1024))

    # Decide weights-resident vs F-streaming from a VMEM footprint estimate.
    weights_vmem = 2 * 2 * D * F * c_itemsize                       # w1+w2, dbl-buf
    io_vmem = 2 * tm_eff * D * (x_itemsize + out_itemsize)          # x/out tiles
    h_vmem = tm_eff * F * 4                                         # f32 hidden tile
    resident_need = weights_vmem + io_vmem + h_vmem + tm_eff * D * 4 + (4 << 20)
    if residency == "always":
        resident = True
    elif residency == "never":
        resident = False
    else:
        resident = resident_need <= vmem_limit

    if resident:
        tf_eff = F
        Fp = F
    else:
        tf_eff = min(_round_up(tf, 128), _round_up(F, 128))
        Fp = _round_up(F, tf_eff)

    x2 = x.reshape(M, D)                       # stays f32 in HBM; cast per-tile
    w1c = w1.astype(compute_dtype)
    w2c = w2.astype(compute_dtype)
    b1c = b1.reshape(1, F).astype(jnp.float32)
    b2c = b2.reshape(1, D).astype(jnp.float32)
    if Fp != F:
        # Zero-padded hidden columns/rows contribute exactly zero to the output.
        w1c = jnp.pad(w1c, ((0, 0), (0, Fp - F)))
        b1c = jnp.pad(b1c, ((0, 0), (0, Fp - F)))
        w2c = jnp.pad(w2c, ((0, Fp - F), (0, 0)))

    # Cost estimate: include the per-row-tile weight re-fetch factor when streaming.
    weight_bytes = 2 * D * Fp * c_itemsize
    weight_passes = 1 if resident else m_steps
    cost = pl.CostEstimate(
        flops=4 * m_steps * tm_eff * D * Fp,
        transcendentals=m_steps * tm_eff * Fp,
        bytes_accessed=int(M * D * x_itemsize + M * D * out_itemsize
                           + weight_passes * weight_bytes + Fp * 4 + D * 4),
    )

    if resident:
        kernel = functools.partial(mlp_resident_kernel, approx_gelu=approx_gelu)
        grid = (m_steps,)
        in_specs = [
            pl.BlockSpec((tm_eff, D), lambda i: (i, 0)),   # x row tile
            pl.BlockSpec((D, Fp), lambda i: (0, 0)),       # w1 (resident)
            pl.BlockSpec((1, Fp), lambda i: (0, 0)),       # b1 (resident)
            pl.BlockSpec((Fp, D), lambda i: (0, 0)),       # w2 (resident)
            pl.BlockSpec((1, D), lambda i: (0, 0)),        # b2 (resident)
        ]
        out_specs = pl.BlockSpec((tm_eff, D), lambda i: (i, 0))
        scratch_shapes = []
        dim_sem = ("parallel",)
    else:
        kernel = functools.partial(mlp_streaming_kernel, approx_gelu=approx_gelu)
        grid = (m_steps, Fp // tf_eff)
        in_specs = [
            pl.BlockSpec((tm_eff, D), lambda i, f: (i, 0)),   # x row tile
            pl.BlockSpec((D, tf_eff), lambda i, f: (0, f)),   # w1 hidden tile
            pl.BlockSpec((1, tf_eff), lambda i, f: (0, f)),   # b1 hidden tile
            pl.BlockSpec((tf_eff, D), lambda i, f: (f, 0)),   # w2 hidden tile
            pl.BlockSpec((1, D), lambda i, f: (0, 0)),        # b2
        ]
        out_specs = pl.BlockSpec((tm_eff, D), lambda i, f: (i, 0))
        scratch_shapes = [pltpu.VMEM((tm_eff, D), jnp.float32)]
        dim_sem = ("parallel", "arbitrary")

    out2 = pl.pallas_call(
        kernel,
        out_shape=jax.ShapeDtypeStruct((M, D), out_dtype),
        grid_spec=pltpu.PrefetchScalarGridSpec(
            num_scalar_prefetch=0,
            grid=grid,
            in_specs=in_specs,
            out_specs=out_specs,
            scratch_shapes=scratch_shapes,
        ),
        compiler_params=pltpu.CompilerParams(
            dimension_semantics=dim_sem,
            vmem_limit_bytes=int(vmem_limit),
        ),
        cost_estimate=cost,
    )(x2, w1c, b1c, w2c, b2c)

    return out2.reshape(B, S, D)


def init_params(key, d_model):
    """Deterministic init mimicking nn.Linear (uniform(-1/sqrt(fan_in), 1/sqrt(fan_in)))."""
    d_ff = d_model * 4
    k1, k2, k3, k4 = jax.random.split(key, 4)
    bound1 = 1.0 / math.sqrt(d_model)
    bound2 = 1.0 / math.sqrt(d_ff)
    w1 = jax.random.uniform(k1, (d_model, d_ff), jnp.float32, -bound1, bound1)
    b1 = jax.random.uniform(k2, (1, d_ff), jnp.float32, -bound1, bound1)
    w2 = jax.random.uniform(k3, (d_ff, d_model), jnp.float32, -bound2, bound2)
    b2 = jax.random.uniform(k4, (1, d_model), jnp.float32, -bound2, bound2)
    return w1, b1, w2, b2


def _ref_mlp(x, w1, b1, w2, b2):
    """Plain-JAX reference with the same bf16-matmul / f32-accumulate / erf-GELU recipe."""
    D = x.shape[-1]
    xb = x.reshape(-1, D).astype(jnp.bfloat16)
    h = jnp.dot(xb, w1.astype(jnp.bfloat16), preferred_element_type=jnp.float32) + b1
    h = 0.5 * h * (1.0 + jax.lax.erf(h / math.sqrt(2.0)))
    o = jnp.dot(h.astype(jnp.bfloat16), w2.astype(jnp.bfloat16),
                preferred_element_type=jnp.float32) + b2
    return o.astype(x.dtype).reshape(x.shape)


if __name__ == "__main__":
    key = jax.random.PRNGKey(0)
    kx1, kx2, kx3, kp1, kp2 = jax.random.split(key, 5)

    # 1) Toy shapes from the module spec (batch=2, seq=8, embedding_dim=32 -> d_ff=128).
    #    Weights trivially fit VMEM -> weights-resident path.
    B, S, D = 2, 8, 32
    x = jax.random.normal(kx1, (B, S, D), jnp.float32)
    w1, b1, w2, b2 = init_params(kp1, D)
    out = jax.block_until_ready(mlp_forward(x, w1, b1, w2, b2))
    ref = _ref_mlp(x, w1, b1, w2, b2)
    assert jnp.allclose(out, ref, atol=2e-2, rtol=2e-2), "resident path mismatch"

    # 2) Force the F-streaming fallback (multi-step hidden reduction + bias fold),
    #    the configuration used for very large models / small-VMEM parts.
    B2, S2, D2 = 2, 8, 64          # F=256 with tf=128 -> 2 F steps
    x2 = jax.random.normal(kx2, (B2, S2, D2), jnp.float32)
    p2 = init_params(kp2, D2)
    out2 = jax.block_until_ready(
        mlp_forward(x2, *p2, tf=128, residency="never"))
    ref2 = _ref_mlp(x2, *p2)
    assert jnp.allclose(out2, ref2, atol=2e-2, rtol=2e-2), "streaming path mismatch"

    # 3) Ragged M (M=640 with tm=512 -> partial edge row-tile handled by Pallas
    #    masking; no wrapper-side jnp.pad of the activations).
    B3, S3 = 2, 320
    x3 = jax.random.normal(kx3, (B3, S3, D), jnp.float32)
    out3 = jax.block_until_ready(mlp_forward(x3, w1, b1, w2, b2))
    ref3 = _ref_mlp(x3, w1, b1, w2, b2)
    assert jnp.allclose(out3, ref3, atol=2e-2, rtol=2e-2), "ragged-M mismatch"

    print("KERNEL_OK")
</pallas_src>

<mosaic_0001>
module attributes {stable_mosaic.version = 11 : i64} {
  func.func @mlp_resident_kernel(%arg0: i32, %arg1: memref<16x32xf32, #tpu.memory_space<vmem>>, %arg2: memref<32x128xbf16, #tpu.memory_space<vmem>>, %arg3: memref<1x128xf32, #tpu.memory_space<vmem>>, %arg4: memref<128x32xbf16, #tpu.memory_space<vmem>>, %arg5: memref<1x32xf32, #tpu.memory_space<vmem>>, %arg6: memref<16x32xf32, #tpu.memory_space<vmem>>) attributes {dimension_semantics = [#tpu.dimension_semantics<parallel>], iteration_bounds = array<i64: 1>, scalar_prefetch = 0 : i64, scratch_operands = 0 : i64, tpu.core_type = #tpu.core_type<tc>, window_params = [{transform_indices = @transform_0, window_bounds = array<i64: 16, 32>}, {pipeline_mode = #tpu.pipeline_mode<synchronous>, transform_indices = @transform_1, window_bounds = array<i64: 32, 128>}, {pipeline_mode = #tpu.pipeline_mode<synchronous>, transform_indices = @transform_2, window_bounds = array<i64: 1, 128>}, {pipeline_mode = #tpu.pipeline_mode<synchronous>, transform_indices = @transform_3, window_bounds = array<i64: 128, 32>}, {pipeline_mode = #tpu.pipeline_mode<synchronous>, transform_indices = @transform_4, window_bounds = array<i64: 1, 32>}, {transform_indices = @transform_5, window_bounds = array<i64: 16, 32>}]} {
    %c0 = arith.constant 0 : index
    %c0_0 = arith.constant 0 : index
    %0 = vector.load %arg1[%c0, %c0_0] : memref<16x32xf32, #tpu.memory_space<vmem>>, vector<16x32xf32>
    %1 = arith.truncf %0 : vector<16x32xf32> to vector<16x32xbf16>
    %c0_1 = arith.constant 0 : index
    %c0_2 = arith.constant 0 : index
    %2 = vector.load %arg2[%c0_1, %c0_2] : memref<32x128xbf16, #tpu.memory_space<vmem>>, vector<32x128xbf16>
    %cst = arith.constant dense<0.000000e+00> : vector<16x128xf32>
    %3 = tpu.matmul %1, %2, %cst {dimension_numbers = #tpu.dot_dimension_numbers<[1], [0], [0], [1], [0, 0, 1, 1], [], []>} : vector<16x32xbf16>, vector<32x128xbf16>, vector<16x128xf32> -> vector<16x128xf32>
    %c0_3 = arith.constant 0 : index
    %c0_4 = arith.constant 0 : index
    %4 = vector.load %arg3[%c0_3, %c0_4] : memref<1x128xf32, #tpu.memory_space<vmem>>, vector<1x128xf32>
    %5 = vector.broadcast %4 : vector<1x128xf32> to vector<16x128xf32>
    %6 = arith.addf %3, %5 : vector<16x128xf32>
    %cst_5 = arith.constant 5.000000e-01 : f32
    %7 = vector.broadcast %cst_5 : f32 to vector<16x128xf32>
    %8 = arith.mulf %7, %6 : vector<16x128xf32>
    %cst_6 = arith.constant 0.707106769 : f32
    %9 = vector.broadcast %cst_6 : f32 to vector<16x128xf32>
    %10 = arith.mulf %6, %9 : vector<16x128xf32>
    %11 = math.erf %10 : vector<16x128xf32>
    %cst_7 = arith.constant 1.000000e+00 : f32
    %12 = vector.broadcast %cst_7 : f32 to vector<16x128xf32>
    %13 = arith.addf %12, %11 : vector<16x128xf32>
    %14 = arith.mulf %8, %13 : vector<16x128xf32>
    %15 = arith.truncf %14 : vector<16x128xf32> to vector<16x128xbf16>
    %c0_8 = arith.constant 0 : index
    %c0_9 = arith.constant 0 : index
    %16 = vector.load %arg4[%c0_8, %c0_9] : memref<128x32xbf16, #tpu.memory_space<vmem>>, vector<128x32xbf16>
    %cst_10 = arith.constant dense<0.000000e+00> : vector<16x32xf32>
    %17 = tpu.matmul %15, %16, %cst_10 {dimension_numbers = #tpu.dot_dimension_numbers<[1], [0], [0], [1], [0, 0, 1, 1], [], []>} : vector<16x128xbf16>, vector<128x32xbf16>, vector<16x32xf32> -> vector<16x32xf32>
    %c0_11 = arith.constant 0 : index
    %c0_12 = arith.constant 0 : index
    %18 = vector.load %arg5[%c0_11, %c0_12] : memref<1x32xf32, #tpu.memory_space<vmem>>, vector<1x32xf32>
    %19 = vector.broadcast %18 : vector<1x32xf32> to vector<16x32xf32>
    %20 = arith.addf %17, %19 : vector<16x32xf32>
    %c0_13 = arith.constant 0 : index
    %c0_14 = arith.constant 0 : index
    %21 = vector.load %arg6[%c0_13, %c0_14] : memref<16x32xf32, #tpu.memory_space<vmem>>, vector<16x32xf32>
    tpu.vector_store %arg6[%c0_13, %c0_14], %20 {strides = array<i32>} : memref<16x32xf32, #tpu.memory_space<vmem>>, vector<16x32xf32>,
    return
  }
  func.func @transform_0(%arg0: i32) -> (i32, i32) {
    %c0_i32 = arith.constant 0 : i32
    %c0_i32_0 = arith.constant 0 : i32
    return %arg0, %c0_i32 : i32, i32
  }
  func.func @transform_1(%arg0: i32) -> (i32, i32) {
    %c0_i32 = arith.constant 0 : i32
    %c0_i32_0 = arith.constant 0 : i32
    %c0_i32_1 = arith.constant 0 : i32
    return %c0_i32, %c0_i32_0 : i32, i32
  }
  func.func @transform_2(%arg0: i32) -> (i32, i32) {
    %c0_i32 = arith.constant 0 : i32
    %c0_i32_0 = arith.constant 0 : i32
    %c0_i32_1 = arith.constant 0 : i32
    return %c0_i32, %c0_i32_0 : i32, i32
  }
  func.func @transform_3(%arg0: i32) -> (i32, i32) {
    %c0_i32 = arith.constant 0 : i32
    %c0_i32_0 = arith.constant 0 : i32
    %c0_i32_1 = arith.constant 0 : i32
    return %c0_i32, %c0_i32_0 : i32, i32
  }
  func.func @transform_4(%arg0: i32) -> (i32, i32) {
    %c0_i32 = arith.constant 0 : i32
    %c0_i32_0 = arith.constant 0 : i32
    %c0_i32_1 = arith.constant 0 : i32
    return %c0_i32, %c0_i32_0 : i32, i32
  }
  func.func @transform_5(%arg0: i32) -> (i32, i32) {
    %c0_i32 = arith.constant 0 : i32
    %c0_i32_0 = arith.constant 0 : i32
    return %arg0, %c0_i32 : i32, i32
  }
}

</mosaic_0001>

<bundles_post_ra>
// kernel: mlp_forward.1
= control target key start
LH: loop header
LB: loop body
LE: loop exit
PB: predicated region body
PF: predicated region fallthrough
CT: control target
= control target key end

     0   :  { %v330_v1 = vmov 0.0   ;;  %vm331_vm0 = vmmov 0   ;;  %vm48_vm1 = vcmask 261120   ;;  %s422_s0 = inlined_call_operand.vmem [shape: f32[16,32], index: 0, kind: input, shape index: {}]   ;;  %s423_s1 = inlined_call_operand.vmem [shape: bf16[32,128], index: 1, kind: input, shape index: {}]   ;;  %s424_s2 = inlined_call_operand.vmem [shape: f32[1,128], index: 2, kind: input, shape index: {}]   ;;  %s425_s3 = inlined_call_operand.vmem [shape: bf16[128,32], index: 3, kind: input, shape index: {}]   ;;  %s426_s4 = inlined_call_operand.vmem [shape: f32[1,32], index: 4, kind: input, shape index: {}]   ;;  %s427_s5 = inlined_call_operand.hbm [shape: f32[16,32], index: 5, kind: output, shape index: {}]  }
   0x1   :  { %v292_v0 = vld [vmem:[%s423_s1] sm:$0xff]   ;;  %259 = vmatprep.subr.bf16.mxu0 %v330_v1  ;;  %v293_v2 = vld [vmem:[%s423_s1 + $0x8] sm:$0xff]   ;;  %267 = vmatprep.subr.bf16.mxu1 %v330_v1 }
   0x2   :  { %260 = vmatpush3.bf16.msra.mxu0 %v292_v0  ;;  %263 = vmatprep.mubr.msk.bf16.mxu0 %vm331_vm0, %v330_v1  ;;  %v22_v3 = vld [vmem:[%s422_s0] sm:$0xff]  ;;  %v23_v4 = vld [vmem:[%s422_s0 + $0x8] sm:$0xff] }
   0x3   :  { %261 = vmatprep.subr.bf16.mxu0 %v330_v1  ;;  %v294_v5 = vld [vmem:[%s425_s3] sm:$0xff]   ;;  %283 = vmatprep.mubr.msk.bf16.mxu1 %vm331_vm0, %v330_v1  ;;  %v295_v6 = vld [vmem:[%s425_s3 + $0x8] sm:$0xff]   ;;  %v24_v7 = vpack.c.bf16 %v23_v4, %v22_v3 }
   0x4   :  { %268 = vmatpush3.bf16.msra.mxu1 %v294_v5 }
   0x5   :  { %269 = vmatprep.subr.bf16.mxu1 %v330_v1 }
   0x6   :  { %262 = vmatpush3.bf16.msra.mxu0 %v293_v2 }
   0x8   :  { %270 = vmatpush3.bf16.msra.mxu1 %v295_v6 }
   0x9   :  { %264 = vmatmul.mubr.msk.bf16.vlgmr.msra.gmra.mrb[0].mxu0 %vm48_vm1, %v24_v7 }
   0xa   :  { %10 = vsyncpa [#allocation3], 0  ;;  %271 = vmatprep.subr.bf16.mxu1 %v330_v1  ;;  %v296_v8 = vld [vmem:[%s425_s3 + $0x10] sm:$0xff]   ;;  %v297_v9 = vld [vmem:[%s425_s3 + $0x18] sm:$0xff]   ;;  %s332_s17 = smov [#allocation2]  }
   0xb   :  { %v298_v10 = vld [vmem:[%s425_s3 + $0x20] sm:$0xff]   ;;  %v299_v11 = vld [vmem:[%s425_s3 + $0x28] sm:$0xff]   ;;  %v300_v12 = vld [vmem:[%s425_s3 + $0x30] sm:$0xff]   ;;  %s223_s18 = sshll.u32 %s332_s17, 4  ;;  %s224_s18 = int_to_ptr.vmem [resolvable:$true] %s223_s18 }
   0xc   :  { %272 = vmatpush3.bf16.msra.mxu1 %v296_v8  ;;  %v301_v13 = vld [vmem:[%s425_s3 + $0x38] sm:$0xff]   ;;  %v234_v14 = vld [vmem:[%s424_s2] ss:$0 sm:$0xff]  ;;  %s306_s19 = scalar_lea.vmem %s224_s18, 256  ;;  %p311_p1 = scmp.lt.s32.totalorder %s224_s18, %s224_s18 }
   0xd   :  { %273 = vmatprep.subr.bf16.mxu1 %v330_v1  ;;  %v238_v32 = vld [vmem:[%s426_s4] ss:$0 sm:$0xff]  ;;  %p307_p0 = scmp.ne.s32.totalorder %s224_s18, %s306_s19  ;;  %p312_p2 = scmp.lt.s32.totalorder %s306_s19, %s306_s19 }
   0xf   :  { %p313_p3 = por %p312_p2, %p311_p1 }
  0x10   :  { %274 = vmatpush3.bf16.msra.mxu1 %v297_v9 }
  0x11   :  { %275 = vmatprep.subr.bf16.mxu1 %v330_v1  ;;  %p314_p4 = pnand %p313_p3, %p307_p0 }
  0x14   :  { %276 = vmatpush3.bf16.msra.mxu1 %v298_v10 }
  0x15   :  { %277 = vmatprep.subr.bf16.mxu1 %v330_v1 }
  0x18   :  { %278 = vmatpush3.bf16.msra.mxu1 %v299_v11 }
  0x19   :  { %279 = vmatprep.subr.bf16.mxu1 %v330_v1 }
  0x1c   :  { %280 = vmatpush3.bf16.msra.mxu1 %v300_v12 }
  0x1d   :  { %281 = vmatprep.subr.bf16.mxu1 %v330_v1 }
  0x20   :  { %282 = vmatpush3.bf16.msra.mxu1 %v301_v13 }
  0xdc   :  { %v86_v15 = vpop.f32.mrb[0].mxu0 }
  0xdd   :  { %v87_v16 = vadd.f32 %v234_v14, %v86_v15  ;;  %v265_v17 = vpop.f32.mrb[1].mxu0 }
  0xde   :  { %v89_v18 = vpop.f32.mrb[2].mxu0 }
  0xdf   :  { %v95_v19 = vmul.f32 0.70710677, %v87_v16  ;;  %v90_v20 = vadd.f32 %v234_v14, %v89_v18  ;;  %v266_v21 = vpop.f32.mrb[3].mxu0  ;;  %v93_v26 = vmul.f32 0.5, %v87_v16 }
  0xe1   :  { %302 = verf.f32 %v95_v19  ;;  %v96_v22 = vmul.f32 0.70710677, %v90_v20  ;;  %v94_v27 = vmul.f32 0.5, %v90_v20 }
  0xe3   :  { %304 = verf.f32 %v96_v22 }
  0xeb   :  { %v303_v23 = vpop.eup %302 }
  0xec   :  { %v99_v24 = vadd.f32 1.0, %v303_v23 }
  0xed   :  { %v305_v25 = vpop.eup %304 }
  0xee   :  { %v100_v28 = vadd.f32 1.0, %v305_v25  ;;  %v101_v29 = vmul.f32 %v99_v24, %v93_v26 }
  0xf0   :  { %v102_v30 = vmul.f32 %v100_v28, %v94_v27 }
  0xf2   :  { %v103_v31 = vpack.c.bf16 %v102_v30, %v101_v29 }
  0xf4   :  { %284 = vmatmul.mubr.bf16.vlgmr.msra.gmra.mrb[0].mxu1 %v103_v31 }
 0x1c7   :  { %v209_v33 = vpop.f32.mrb[0].mxu1 }
 0x1c8   :  { %v210_v34 = vadd.f32 %v238_v32, %v209_v33  ;;  %v285_v35 = vpop.f32.mrb[1].mxu1 }
 0x1c9   :  { %v212_v36 = vpop.f32.mrb[2].mxu1 }
 0x1ca   :  { %216 = vst.msk [vmem:[#allocation2] sm:$0xff] %vm48_vm1, %v210_v34  ;;  %v213_v37 = vadd.f32 %v238_v32, %v212_v36  ;;  %v286_v38 = vpop.f32.mrb[3].mxu1 }
 0x1cc   :  { %217 = vst.msk [vmem:[#allocation2 + $0x8] sm:$0xff] %vm48_vm1, %v213_v37 }
 0x1cd   :  { %317 = shalt.err (!%p314_p4)
}
 0x1ce   :  { %s318_s21 = scalar_lea.hbm %s427_s5, 256 }
 0x1cf   :  { %p319_p5 = scmp.ne.s32.totalorder %s427_s5, %s318_s21  ;;  %p322_p6 = scmp.lt.u32.totalorder %s318_s21, %s427_s5 }
 0x1d1   :  { %p324_p7 = pnand %p322_p6, %p319_p5 }
 0x1d3   :  { %327 = shalt.err (!%p324_p7)
}
 0x1d4   :  { %s333_s26 = smov 128   ;;  %s334_s27 = smov 8  }
 0x1d5   :  { %229 = dma.vmem_to_hbm [thread:$0]  %s224_s18, 256, %s427_s5, [#allocation3], %s333_s26, %s333_s26, %s334_s27  }
 0x1d6   :  { %328 = dma.done.wait [#allocation3], 256  }
 0x1d7   :  { %329 = vsyncadd [#allocation3], 4294967040 }
 0x1d8   :  { %233 = vsyncpa [#allocation3], 1 }

</bundles_post_ra>
